<compile_context>
chip_gen: v5e
topology: v5e:2x2
jax: 0.10.0
libtpu: 0.0.40
codegen_flags: <defaults>
</compile_context>

<pallas_src>
import math

import jax
import jax.numpy as jnp
from jax.experimental import pallas as pl
from jax.experimental.pallas import tpu as pltpu


OUT_PAD = 8            # narrow lane-padded output width; true output width is 3
_MIB = 1024 * 1024


def _leaky_relu(x, negative_slope=0.01):
    return jnp.where(x > 0, x, negative_slope * x)


def _round_up(x, m):
    return (x + m - 1) // m * m


def _cdiv(a, b):
    return -(-a // b)


def fc_encode_kernel(x_ref,
                     w1_ref, g_ref, b_ref,
                     w2_ref, w3_ref, w4_ref, w5_ref, w6_ref, w7_ref,
                     o_ref):
    # bf16 feeds the MXU directly (no-op when the caller already provides bf16);
    # all elementwise / LayerNorm math below stays in f32.
    xb = x_ref[...].astype(jnp.bfloat16)

    # --- Linear(n, n/4) + LayerNorm + LeakyReLU ---
    h = jnp.dot(xb, w1_ref[...], preferred_element_type=jnp.float32)
    d1 = h.shape[-1]
    inv_d1 = 1.0 / d1
    s = jnp.sum(h, axis=-1, keepdims=True)
    s2 = jnp.sum(h * h, axis=-1, keepdims=True)
    mean = s * inv_d1
    var = s2 * inv_d1 - mean * mean
    h = (h - mean) * jax.lax.rsqrt(var + 1e-5)
    h = h * g_ref[...] + b_ref[...]
    h = _leaky_relu(h)

    # --- Linear(n/4, n/8) + LeakyReLU (+ Dropout p=0.1 -> identity in eval) ---
    # TODO(synk): training-mode dropout (p=0.1) not implemented; eval-mode identity used.
    h = _leaky_relu(jnp.dot(h.astype(jnp.bfloat16), w2_ref[...],
                            preferred_element_type=jnp.float32))
    # --- Linear(n/8, n/16) + LeakyReLU ---
    h = _leaky_relu(jnp.dot(h.astype(jnp.bfloat16), w3_ref[...],
                            preferred_element_type=jnp.float32))
    # --- Linear(n/16, n/32) + LeakyReLU ---
    h = _leaky_relu(jnp.dot(h.astype(jnp.bfloat16), w4_ref[...],
                            preferred_element_type=jnp.float32))
    # --- Linear(n/32, n/64) + LeakyReLU ---
    h = _leaky_relu(jnp.dot(h.astype(jnp.bfloat16), w5_ref[...],
                            preferred_element_type=jnp.float32))
    # --- Linear(n/64, n/64) + LeakyReLU ---
    h = _leaky_relu(jnp.dot(h.astype(jnp.bfloat16), w6_ref[...],
                            preferred_element_type=jnp.float32))

    # --- Linear(n/64, 3), zero-padded to OUT_PAD columns ---
    o_ref[...] = jnp.dot(h.astype(jnp.bfloat16), w7_ref[...],
                         preferred_element_type=jnp.float32).astype(o_ref.dtype)


def _vmem_budget_bytes():
    """Physical VMEM capacity minus headroom (caps correctly on v7x's 64 MiB)."""
    try:
        cap = int(pltpu.get_tpu_info().vmem_capacity_bytes)
    except Exception:
        cap = 64 * _MIB  # conservative fallback (v7x physical size)
    return max(16 * _MIB, cap - 8 * _MIB)


def _plan_tiling(B, n, x_itemsize, weight_bytes, vmem_budget):
    """Pick (TB, steps): ~4 MiB of x per step, minimal padding (TB = round_up
    of ceil(B/steps)), >=2 steps when B permits (two-TC sharding on v7x), and
    shrink TB until resident weights + double-buffered tiles fit VMEM."""
    target_bytes = 4 * _MIB
    tb_max = max(256, min(4096, _round_up(target_bytes // max(1, n * x_itemsize), 8)))
    steps = max(1, _cdiv(B, tb_max))
    if B >= 16:
        steps = max(steps, 2)
    while True:
        tb = _round_up(_cdiv(B, steps), 8)
        need = (2 * weight_bytes                 # resident weights (<=2 buffers)
                + 2 * tb * n * x_itemsize        # double-buffered x tile
                + 2 * tb * OUT_PAD * 4           # double-buffered output tile
                + 4 * tb * (n // 4) * 4)         # f32 activation headroom
        if need <= vmem_budget or tb <= 8:
            break
        steps += 1
    return tb, steps, need


def fc_encode_forward(x, params):
    """x: (B, n_feats); pass bf16 for best bandwidth (f32 also accepted)."""
    B, n = x.shape
    weights = (params["w1"], params["ln_gamma"], params["ln_beta"],
               params["w2"], params["w3"], params["w4"],
               params["w5"], params["w6"], params["w7"])
    weight_bytes = sum(int(w.size) * w.dtype.itemsize for w in weights)
    # TODO(synk): for very large n_feats where w1 (n*n/4 bf16) cannot stay
    # VMEM-resident, a K-tiled first layer (extra "arbitrary" grid axis with an
    # f32 accumulator) would be required; not implemented here.
    budget = _vmem_budget_bytes()
    TB, steps, need = _plan_tiling(B, n, x.dtype.itemsize, weight_bytes, budget)
    B_pad = steps * TB
    if B_pad != B:
        x = jnp.pad(x, ((0, B_pad - B), (0, 0)))

    vmem_limit = int(min(budget, max(32 * _MIB, need + 4 * _MIB)))
    resident = pl.BlockSpec(memory_space=pltpu.MemorySpace.VMEM)  # DMA'd once, stays resident
    out = pl.pallas_call(
        fc_encode_kernel,
        out_shape=jax.ShapeDtypeStruct((B_pad, OUT_PAD), jnp.float32),
        grid=(steps,),
        in_specs=[pl.BlockSpec((TB, n), lambda i: (i, 0))] + [resident] * len(weights),
        out_specs=pl.BlockSpec((TB, OUT_PAD), lambda i: (i, 0)),
        compiler_params=pltpu.CompilerParams(
            dimension_semantics=("parallel",),
            vmem_limit_bytes=vmem_limit),
    )(x, *weights)
    return out[:B, :3]


def _xavier_uniform(key, fan_in, fan_out):
    # torch.nn.init.xavier_uniform_ with gain=1; stored (in, out) so kernel does x @ W.
    bound = math.sqrt(6.0 / (fan_in + fan_out))
    return jax.random.uniform(key, (fan_in, fan_out), jnp.float32, -bound, bound)


def init_params(key, n_feats):
    assert n_feats % 64 == 0, "n_feats must be divisible by 64"
    dims = [n_feats, n_feats // 4, n_feats // 8, n_feats // 16,
            n_feats // 32, n_feats // 64, n_feats // 64, 3]
    keys = jax.random.split(key, 7)
    params = {}
    for i in range(7):
        w = _xavier_uniform(keys[i], dims[i], dims[i + 1]).astype(jnp.bfloat16)
        if i == 6:  # pad last layer to OUT_PAD output columns (exact zeros)
            w = jnp.pad(w, ((0, 0), (0, OUT_PAD - dims[i + 1])))
        params[f"w{i + 1}"] = w
    # LayerNorm(n_feats // 4): gamma=1, beta=0 (kept 2D + f32 for TPU layout)
    params["ln_gamma"] = jnp.ones((1, n_feats // 4), jnp.float32)
    params["ln_beta"] = jnp.zeros((1, n_feats // 4), jnp.float32)
    return params


def _reference_forward(x, params):
    """Plain-JAX reference mirroring the kernel's bf16 matmul inputs."""
    def dot(a, w):
        return jnp.dot(a.astype(jnp.bfloat16), w, preferred_element_type=jnp.float32)

    h = dot(x, params["w1"])
    mean = h.mean(-1, keepdims=True)
    var = ((h - mean) ** 2).mean(-1, keepdims=True)
    h = (h - mean) / jnp.sqrt(var + 1e-5)
    h = h * params["ln_gamma"] + params["ln_beta"]
    h = _leaky_relu(h)
    for name in ("w2", "w3", "w4", "w5", "w6"):
        h = _leaky_relu(dot(h, params[name]))
    return dot(h, params["w7"])[:, :3]


if __name__ == "__main__":
    n_feats = 256
    batch = 8

    key = jax.random.PRNGKey(0)
    k_params, k_x = jax.random.split(key)
    params = init_params(k_params, n_feats)
    # Producer-side bf16 activations: halves the dominant HBM read of the kernel.
    x = jax.random.normal(k_x, (batch, n_feats), jnp.float32).astype(jnp.bfloat16)

    out = fc_encode_forward(x, params)
    out = jax.block_until_ready(out)

    ref = _reference_forward(x, params)
    assert out.shape == (batch, 3), out.shape
    # bf16 matmul inputs => relaxed tolerance vs. a pure-f32 check.
    assert jnp.allclose(out, ref, atol=2e-2, rtol=2e-2), "mismatch vs reference"

    print("KERNEL_OK")
</pallas_src>

<mosaic_0001>
module attributes {stable_mosaic.version = 11 : i64} {
  func.func @fc_encode_kernel(%arg0: i32, %arg1: memref<8x256xbf16, #tpu.memory_space<vmem>>, %arg2: memref<256x64xbf16, #tpu.memory_space<vmem>>, %arg3: memref<1x64xf32, #tpu.memory_space<vmem>>, %arg4: memref<1x64xf32, #tpu.memory_space<vmem>>, %arg5: memref<64x32xbf16, #tpu.memory_space<vmem>>, %arg6: memref<32x16xbf16, #tpu.memory_space<vmem>>, %arg7: memref<16x8xbf16, #tpu.memory_space<vmem>>, %arg8: memref<8x4xbf16, #tpu.memory_space<vmem>>, %arg9: memref<4x4xbf16, #tpu.memory_space<vmem>>, %arg10: memref<4x8xbf16, #tpu.memory_space<vmem>>, %arg11: memref<8x8xf32, #tpu.memory_space<vmem>>) attributes {dimension_semantics = [#tpu.dimension_semantics<parallel>], iteration_bounds = array<i64: 1>, scalar_prefetch = 0 : i64, scratch_operands = 0 : i64, tpu.core_type = #tpu.core_type<tc>, window_params = [{transform_indices = @transform_0, window_bounds = array<i64: 8, 256>}, {pipeline_mode = #tpu.pipeline_mode<synchronous>, transform_indices = @transform_1, window_bounds = array<i64: 256, 64>}, {pipeline_mode = #tpu.pipeline_mode<synchronous>, transform_indices = @transform_2, window_bounds = array<i64: 1, 64>}, {pipeline_mode = #tpu.pipeline_mode<synchronous>, transform_indices = @transform_3, window_bounds = array<i64: 1, 64>}, {pipeline_mode = #tpu.pipeline_mode<synchronous>, transform_indices = @transform_4, window_bounds = array<i64: 64, 32>}, {pipeline_mode = #tpu.pipeline_mode<synchronous>, transform_indices = @transform_5, window_bounds = array<i64: 32, 16>}, {pipeline_mode = #tpu.pipeline_mode<synchronous>, transform_indices = @transform_6, window_bounds = array<i64: 16, 8>}, {pipeline_mode = #tpu.pipeline_mode<synchronous>, transform_indices = @transform_7, window_bounds = array<i64: 8, 4>}, {pipeline_mode = #tpu.pipeline_mode<synchronous>, transform_indices = @transform_8, window_bounds = array<i64: 4, 4>}, {pipeline_mode = #tpu.pipeline_mode<synchronous>, transform_indices = @transform_9, window_bounds = array<i64: 4, 8>}, {transform_indices = @transform_10, window_bounds = array<i64: 8, 8>}]} {
    %c0 = arith.constant 0 : index
    %c0_0 = arith.constant 0 : index
    %0 = vector.load %arg1[%c0, %c0_0] : memref<8x256xbf16, #tpu.memory_space<vmem>>, vector<8x256xbf16>
    %c0_1 = arith.constant 0 : index
    %c0_2 = arith.constant 0 : index
    %1 = vector.load %arg2[%c0_1, %c0_2] : memref<256x64xbf16, #tpu.memory_space<vmem>>, vector<256x64xbf16>
    %cst = arith.constant dense<0.000000e+00> : vector<8x64xf32>
    %2 = tpu.matmul %0, %1, %cst {dimension_numbers = #tpu.dot_dimension_numbers<[1], [0], [0], [1], [0, 0, 1, 1], [], []>} : vector<8x256xbf16>, vector<256x64xbf16>, vector<8x64xf32> -> vector<8x64xf32>
    %cst_3 = arith.constant dense<0.000000e+00> : vector<8xf32>
    %3 = vector.multi_reduction <add>, %2, %cst_3 [1] : vector<8x64xf32> to vector<8xf32>
    %4 = vector.shape_cast %3 : vector<8xf32> to vector<8x1xf32>
    %5 = arith.mulf %2, %2 : vector<8x64xf32>
    %cst_4 = arith.constant dense<0.000000e+00> : vector<8xf32>
    %6 = vector.multi_reduction <add>, %5, %cst_4 [1] : vector<8x64xf32> to vector<8xf32>
    %7 = vector.shape_cast %6 : vector<8xf32> to vector<8x1xf32>
    %cst_5 = arith.constant 1.562500e-02 : f32
    %8 = vector.broadcast %cst_5 : f32 to vector<8x1xf32>
    %9 = arith.mulf %4, %8 : vector<8x1xf32>
    %cst_6 = arith.constant 1.562500e-02 : f32
    %10 = vector.broadcast %cst_6 : f32 to vector<8x1xf32>
    %11 = arith.mulf %7, %10 : vector<8x1xf32>
    %12 = arith.mulf %9, %9 : vector<8x1xf32>
    %13 = arith.subf %11, %12 : vector<8x1xf32>
    %14 = vector.broadcast %9 : vector<8x1xf32> to vector<8x64xf32>
    %15 = arith.subf %2, %14 : vector<8x64xf32>
    %cst_7 = arith.constant 9.99999974E-6 : f32
    %16 = vector.broadcast %cst_7 : f32 to vector<8x1xf32>
    %17 = arith.addf %13, %16 : vector<8x1xf32>
    %18 = math.rsqrt %17 : vector<8x1xf32>
    %19 = vector.broadcast %18 : vector<8x1xf32> to vector<8x64xf32>
    %20 = arith.mulf %15, %19 : vector<8x64xf32>
    %c0_8 = arith.constant 0 : index
    %c0_9 = arith.constant 0 : index
    %21 = vector.load %arg3[%c0_8, %c0_9] : memref<1x64xf32, #tpu.memory_space<vmem>>, vector<1x64xf32>
    %22 = vector.broadcast %21 : vector<1x64xf32> to vector<8x64xf32>
    %23 = arith.mulf %20, %22 : vector<8x64xf32>
    %c0_10 = arith.constant 0 : index
    %c0_11 = arith.constant 0 : index
    %24 = vector.load %arg4[%c0_10, %c0_11] : memref<1x64xf32, #tpu.memory_space<vmem>>, vector<1x64xf32>
    %25 = vector.broadcast %24 : vector<1x64xf32> to vector<8x64xf32>
    %26 = arith.addf %23, %25 : vector<8x64xf32>
    %cst_12 = arith.constant 0.000000e+00 : f32
    %27 = vector.broadcast %cst_12 : f32 to vector<8x64xf32>
    %28 = arith.cmpf ogt, %26, %27 : vector<8x64xf32>
    %cst_13 = arith.constant 0.00999999977 : f32
    %29 = vector.broadcast %cst_13 : f32 to vector<8x64xf32>
    %30 = arith.mulf %29, %26 : vector<8x64xf32>
    %31 = arith.select %28, %26, %30 : vector<8x64xi1>, vector<8x64xf32>
    %32 = arith.truncf %31 : vector<8x64xf32> to vector<8x64xbf16>
    %c0_14 = arith.constant 0 : index
    %c0_15 = arith.constant 0 : index
    %33 = vector.load %arg5[%c0_14, %c0_15] : memref<64x32xbf16, #tpu.memory_space<vmem>>, vector<64x32xbf16>
    %cst_16 = arith.constant dense<0.000000e+00> : vector<8x32xf32>
    %34 = tpu.matmul %32, %33, %cst_16 {dimension_numbers = #tpu.dot_dimension_numbers<[1], [0], [0], [1], [0, 0, 1, 1], [], []>} : vector<8x64xbf16>, vector<64x32xbf16>, vector<8x32xf32> -> vector<8x32xf32>
    %cst_17 = arith.constant 0.000000e+00 : f32
    %35 = vector.broadcast %cst_17 : f32 to vector<8x32xf32>
    %36 = arith.cmpf ogt, %34, %35 : vector<8x32xf32>
    %cst_18 = arith.constant 0.00999999977 : f32
    %37 = vector.broadcast %cst_18 : f32 to vector<8x32xf32>
    %38 = arith.mulf %37, %34 : vector<8x32xf32>
    %39 = arith.select %36, %34, %38 : vector<8x32xi1>, vector<8x32xf32>
    %40 = arith.truncf %39 : vector<8x32xf32> to vector<8x32xbf16>
    %c0_19 = arith.constant 0 : index
    %c0_20 = arith.constant 0 : index
    %41 = vector.load %arg6[%c0_19, %c0_20] : memref<32x16xbf16, #tpu.memory_space<vmem>>, vector<32x16xbf16>
    %cst_21 = arith.constant dense<0.000000e+00> : vector<8x16xf32>
    %42 = tpu.matmul %40, %41, %cst_21 {dimension_numbers = #tpu.dot_dimension_numbers<[1], [0], [0], [1], [0, 0, 1, 1], [], []>} : vector<8x32xbf16>, vector<32x16xbf16>, vector<8x16xf32> -> vector<8x16xf32>
    %cst_22 = arith.constant 0.000000e+00 : f32
    %43 = vector.broadcast %cst_22 : f32 to vector<8x16xf32>
    %44 = arith.cmpf ogt, %42, %43 : vector<8x16xf32>
    %cst_23 = arith.constant 0.00999999977 : f32
    %45 = vector.broadcast %cst_23 : f32 to vector<8x16xf32>
    %46 = arith.mulf %45, %42 : vector<8x16xf32>
    %47 = arith.select %44, %42, %46 : vector<8x16xi1>, vector<8x16xf32>
    %48 = arith.truncf %47 : vector<8x16xf32> to vector<8x16xbf16>
    %c0_24 = arith.constant 0 : index
    %c0_25 = arith.constant 0 : index
    %49 = vector.load %arg7[%c0_24, %c0_25] : memref<16x8xbf16, #tpu.memory_space<vmem>>, vector<16x8xbf16>
    %cst_26 = arith.constant dense<0.000000e+00> : vector<8x8xf32>
    %50 = tpu.matmul %48, %49, %cst_26 {dimension_numbers = #tpu.dot_dimension_numbers<[1], [0], [0], [1], [0, 0, 1, 1], [], []>} : vector<8x16xbf16>, vector<16x8xbf16>, vector<8x8xf32> -> vector<8x8xf32>
    %cst_27 = arith.constant 0.000000e+00 : f32
    %51 = vector.broadcast %cst_27 : f32 to vector<8x8xf32>
    %52 = arith.cmpf ogt, %50, %51 : vector<8x8xf32>
    %cst_28 = arith.constant 0.00999999977 : f32
    %53 = vector.broadcast %cst_28 : f32 to vector<8x8xf32>
    %54 = arith.mulf %53, %50 : vector<8x8xf32>
    %55 = arith.select %52, %50, %54 : vector<8x8xi1>, vector<8x8xf32>
    %56 = arith.truncf %55 : vector<8x8xf32> to vector<8x8xbf16>
    %c0_29 = arith.constant 0 : index
    %c0_30 = arith.constant 0 : index
    %57 = vector.load %arg8[%c0_29, %c0_30] : memref<8x4xbf16, #tpu.memory_space<vmem>>, vector<8x4xbf16>
    %cst_31 = arith.constant dense<0.000000e+00> : vector<8x4xf32>
    %58 = tpu.matmul %56, %57, %cst_31 {dimension_numbers = #tpu.dot_dimension_numbers<[1], [0], [0], [1], [0, 0, 1, 1], [], []>} : vector<8x8xbf16>, vector<8x4xbf16>, vector<8x4xf32> -> vector<8x4xf32>
    %cst_32 = arith.constant 0.000000e+00 : f32
    %59 = vector.broadcast %cst_32 : f32 to vector<8x4xf32>
    %60 = arith.cmpf ogt, %58, %59 : vector<8x4xf32>
    %cst_33 = arith.constant 0.00999999977 : f32
    %61 = vector.broadcast %cst_33 : f32 to vector<8x4xf32>
    %62 = arith.mulf %61, %58 : vector<8x4xf32>
    %63 = arith.select %60, %58, %62 : vector<8x4xi1>, vector<8x4xf32>
    %64 = arith.truncf %63 : vector<8x4xf32> to vector<8x4xbf16>
    %c0_34 = arith.constant 0 : index
    %c0_35 = arith.constant 0 : index
    %65 = vector.load %arg9[%c0_34, %c0_35] : memref<4x4xbf16, #tpu.memory_space<vmem>>, vector<4x4xbf16>
    %cst_36 = arith.constant dense<0.000000e+00> : vector<8x4xf32>
    %66 = tpu.matmul %64, %65, %cst_36 {dimension_numbers = #tpu.dot_dimension_numbers<[1], [0], [0], [1], [0, 0, 1, 1], [], []>} : vector<8x4xbf16>, vector<4x4xbf16>, vector<8x4xf32> -> vector<8x4xf32>
    %cst_37 = arith.constant 0.000000e+00 : f32
    %67 = vector.broadcast %cst_37 : f32 to vector<8x4xf32>
    %68 = arith.cmpf ogt, %66, %67 : vector<8x4xf32>
    %cst_38 = arith.constant 0.00999999977 : f32
    %69 = vector.broadcast %cst_38 : f32 to vector<8x4xf32>
    %70 = arith.mulf %69, %66 : vector<8x4xf32>
    %71 = arith.select %68, %66, %70 : vector<8x4xi1>, vector<8x4xf32>
    %72 = arith.truncf %71 : vector<8x4xf32> to vector<8x4xbf16>
    %c0_39 = arith.constant 0 : index
    %c0_40 = arith.constant 0 : index
    %73 = vector.load %arg10[%c0_39, %c0_40] : memref<4x8xbf16, #tpu.memory_space<vmem>>, vector<4x8xbf16>
    %cst_41 = arith.constant dense<0.000000e+00> : vector<8x8xf32>
    %74 = tpu.matmul %72, %73, %cst_41 {dimension_numbers = #tpu.dot_dimension_numbers<[1], [0], [0], [1], [0, 0, 1, 1], [], []>} : vector<8x4xbf16>, vector<4x8xbf16>, vector<8x8xf32> -> vector<8x8xf32>
    %c0_42 = arith.constant 0 : index
    %c0_43 = arith.constant 0 : index
    %75 = vector.load %arg11[%c0_42, %c0_43] : memref<8x8xf32, #tpu.memory_space<vmem>>, vector<8x8xf32>
    tpu.vector_store %arg11[%c0_42, %c0_43], %74 {strides = array<i32>} : memref<8x8xf32, #tpu.memory_space<vmem>>, vector<8x8xf32>,
    return
  }
  func.func @transform_0(%arg0: i32) -> (i32, i32) {
    %c0_i32 = arith.constant 0 : i32
    %c0_i32_0 = arith.constant 0 : i32
    return %arg0, %c0_i32 : i32, i32
  }
  func.func @transform_1(%arg0: i32) -> (i32, i32) {
    %c0_i32 = arith.constant 0 : i32
    %c0_i32_0 = arith.constant 0 : i32
    %c0_i32_1 = arith.constant 0 : i32
    return %c0_i32, %c0_i32_0 : i32, i32
  }
  func.func @transform_2(%arg0: i32) -> (i32, i32) {
    %c0_i32 = arith.constant 0 : i32
    %c0_i32_0 = arith.constant 0 : i32
    %c0_i32_1 = arith.constant 0 : i32
    return %c0_i32, %c0_i32_0 : i32, i32
  }
  func.func @transform_3(%arg0: i32) -> (i32, i32) {
    %c0_i32 = arith.constant 0 : i32
    %c0_i32_0 = arith.constant 0 : i32
    %c0_i32_1 = arith.constant 0 : i32
    return %c0_i32, %c0_i32_0 : i32, i32
  }
  func.func @transform_4(%arg0: i32) -> (i32, i32) {
    %c0_i32 = arith.constant 0 : i32
    %c0_i32_0 = arith.constant 0 : i32
    %c0_i32_1 = arith.constant 0 : i32
    return %c0_i32, %c0_i32_0 : i32, i32
  }
  func.func @transform_5(%arg0: i32) -> (i32, i32) {
    %c0_i32 = arith.constant 0 : i32
    %c0_i32_0 = arith.constant 0 : i32
    %c0_i32_1 = arith.constant 0 : i32
    return %c0_i32, %c0_i32_0 : i32, i32
  }
  func.func @transform_6(%arg0: i32) -> (i32, i32) {
    %c0_i32 = arith.constant 0 : i32
    %c0_i32_0 = arith.constant 0 : i32
    %c0_i32_1 = arith.constant 0 : i32
    return %c0_i32, %c0_i32_0 : i32, i32
  }
  func.func @transform_7(%arg0: i32) -> (i32, i32) {
    %c0_i32 = arith.constant 0 : i32
    %c0_i32_0 = arith.constant 0 : i32
    %c0_i32_1 = arith.constant 0 : i32
    return %c0_i32, %c0_i32_0 : i32, i32
  }
  func.func @transform_8(%arg0: i32) -> (i32, i32) {
    %c0_i32 = arith.constant 0 : i32
    %c0_i32_0 = arith.constant 0 : i32
    %c0_i32_1 = arith.constant 0 : i32
    return %c0_i32, %c0_i32_0 : i32, i32
  }
  func.func @transform_9(%arg0: i32) -> (i32, i32) {
    %c0_i32 = arith.constant 0 : i32
    %c0_i32_0 = arith.constant 0 : i32
    %c0_i32_1 = arith.constant 0 : i32
    return %c0_i32, %c0_i32_0 : i32, i32
  }
  func.func @transform_10(%arg0: i32) -> (i32, i32) {
    %c0_i32 = arith.constant 0 : i32
    %c0_i32_0 = arith.constant 0 : i32
    return %arg0, %c0_i32 : i32, i32
  }
}

</mosaic_0001>

<bundles_post_ra>
// kernel: tpu_custom_call.1
= control target key start
LH: loop header
LB: loop body
LE: loop exit
PB: predicated region body
PF: predicated region fallthrough
CT: control target
= control target key end

     0   :  { %s748_s0 = inlined_call_operand.vmem [shape: bf16[8,256], index: 0, kind: input, shape index: {}]   ;;  %s749_s1 = inlined_call_operand.vmem [shape: bf16[256,64], index: 1, kind: input, shape index: {}]   ;;  %s750_s2 = inlined_call_operand.vmem [shape: f32[1,64], index: 2, kind: input, shape index: {}]   ;;  %s751_s3 = inlined_call_operand.vmem [shape: f32[1,64], index: 3, kind: input, shape index: {}]   ;;  %s752_s4 = inlined_call_operand.vmem [shape: bf16[64,32], index: 4, kind: input, shape index: {}]   ;;  %s753_s5 = inlined_call_operand.vmem [shape: bf16[32,16], index: 5, kind: input, shape index: {}]   ;;  %s754_s6 = inlined_call_operand.vmem [shape: bf16[16,8], index: 6, kind: input, shape index: {}]   ;;  %s755_s7 = inlined_call_operand.vmem [shape: bf16[8,4], index: 7, kind: input, shape index: {}]   ;;  %s756_s8 = inlined_call_operand.vmem [shape: bf16[4,4], index: 8, kind: input, shape index: {}]   ;;  %s757_s9 = inlined_call_operand.vmem [shape: bf16[4,8], index: 9, kind: input, shape index: {}]   ;;  %s758_s10 = inlined_call_operand.hbm [shape: f32[8,8], index: 10, kind: output, shape index: {}]  }
   0x1   :  { %v550_v0 = vld [vmem:[%s749_s1 + $0x38] sm:$0xff]  ;;  %v549_v2 = vld [vmem:[%s749_s1 + $0x30] sm:$0xff]  ;;  %v548_v4 = vld [vmem:[%s749_s1 + $0x28] sm:$0xff] }
   0x2   :  { %v558_v1 = vld [vmem:[%s749_s1 + $0x78] sm:$0xff]  ;;  %173 = vmatpush.bf16.msra.mxu0 %v550_v0  ;;  %v557_v3 = vld [vmem:[%s749_s1 + $0x70] sm:$0xff]  ;;  %v556_v5 = vld [vmem:[%s749_s1 + $0x68] sm:$0xff] }
   0x3   :  { %186 = vmatpush.bf16.msra.mxu1 %v558_v1 }
   0x6   :  { %174 = vmatpush.bf16.msra.mxu0 %v549_v2 }
   0x7   :  { %187 = vmatpush.bf16.msra.mxu1 %v557_v3 }
   0x8   :  { %15 = vsyncpa [#allocation3], 0  ;;  %v547_v6 = vld [vmem:[%s749_s1 + $0x20] sm:$0xff]  ;;  %v546_v8 = vld [vmem:[%s749_s1 + $0x18] sm:$0xff]  ;;  %vm199_vm0 = vcmask 523264   ;;  %vm306_vm6 = vcmask 261120  }
   0x9   :  { %v555_v7 = vld [vmem:[%s749_s1 + $0x60] sm:$0xff]  ;;  %v554_v9 = vld [vmem:[%s749_s1 + $0x58] sm:$0xff]  ;;  %v545_v10 = vld [vmem:[%s749_s1 + $0x10] sm:$0xff]  ;;  %vm361_vm7 = vcmask 1043456   ;;  %vm335_vm9 = vcmask 130048   ;;  %vm387_vm10 = vcmask 1041408  }
   0xa   :  { %175 = vmatpush.bf16.msra.mxu0 %v548_v4  ;;  %v553_v11 = vld [vmem:[%s749_s1 + $0x50] sm:$0xff]  ;;  %v544_v12 = vld [vmem:[%s749_s1 + $0x8] sm:$0xff]  ;;  %v37_v14 = vld [vmem:[%s748_s0] sm:$0xff]  ;;  %vm357_vm12 = vcmask 64512   ;;  %vm383_vm14 = vcmask 31744   ;;  %s436_s25 = sshll.u32 %s758_s10, 4  ;;  %s437_s25 = int_to_ptr.hbm [resolvable:$true] %s436_s25 }
   0xb   :  { %188 = vmatpush.bf16.msra.mxu1 %v556_v5  ;;  %v552_v13 = vld [vmem:[%s749_s1 + $0x48] sm:$0xff]  ;;  %v71_v15 = vunpack.c.l.b16 %v37_v14  ;;  %v72_v16 = vunpack.c.h.b16 %v37_v14  ;;  %v543_v17 = vld [vmem:[%s749_s1] sm:$0xff]  ;;  %v562_v29 = vld [vmem:[%s752_s4 + $0x18] sm:$0xff] }
   0xc   :  { %v551_v18 = vld [vmem:[%s749_s1 + $0x40] sm:$0xff]  ;;  %277 = vmatpush.bf16.msra.mxu2 %v562_v29  ;;  %v561_v30 = vld [vmem:[%s752_s4 + $0x10] sm:$0xff]  ;;  %v560_v32 = vld [vmem:[%s752_s4 + $0x8] sm:$0xff] }
   0xd   :  { %v73_v19 = vpack.c.b16 %v71_v15, %v71_v15  ;;  %v74_v20 = vpack.c.b16 %v72_v16, %v72_v16  ;;  %v559_v34 = vld [vmem:[%s752_s4] sm:$0xff]  ;;  %v564_v39 = vld [vmem:[%s753_s5 + $0x8] sm:$0xff] }
   0xe   :  { %176 = vmatpush.bf16.msra.mxu0 %v547_v6  ;;  %316 = vmatpush.bf16.msra.mxu3 %v564_v39  ;;  %v567_v48 = vld [vmem:[%s750_s2] ss:$0 sm:$0xff] }
   0xf   :  { %189 = vmatpush.bf16.msra.mxu1 %v555_v7  ;;  %v568_v51 = vld [vmem:[%s751_s3] ss:$0 sm:$0xff] }
  0x10   :  { %278 = vmatpush.bf16.msra.mxu2 %v561_v30  ;;  %v563_v57 = vld [vmem:[%s753_s5] sm:$0xff] }
  0x11   :  { %v565_v58 = vld [vmem:[%s754_s6] sm:$0xff] }
  0x12   :  { %177 = vmatpush.bf16.msra.mxu0 %v546_v8  ;;  %317 = vmatpush.bf16.msra.mxu3 %v563_v57  ;;  %v356_v0 = vld [vmem:[%s755_s7] sm:$0xf] }
  0x13   :  { %190 = vmatpush.bf16.msra.mxu1 %v554_v9  ;;  %v363_v1 = vsel %vm361_vm7, %v356_v0, 0  ;;  %v382_v7 = vld [vmem:[%s756_s8] sm:$0x3]  ;;  %s597_s8 = smov [#allocation2]  }
  0x14   :  { %279 = vmatpush.bf16.msra.mxu2 %v560_v32  ;;  %v389_v8 = vsel %vm387_vm10, %v382_v7, 0  ;;  %v408_v14 = vld [vmem:[%s757_s9] sm:$0x3]  ;;  %s434_s23 = sshll.u32 %s597_s8, 4  ;;  %s435_s23 = int_to_ptr.vmem [resolvable:$true] %s434_s23 }
  0x15   :  { %v413_v15 = vsel %vm387_vm10, %v408_v14, 0 }
  0x16   :  { %178 = vmatpush.bf16.msra.mxu0 %v545_v10  ;;  %346 = vmatpush.bf16.msrb.mxu3 %v565_v58 }
  0x17   :  { %191 = vmatpush.bf16.msra.mxu1 %v553_v11 }
  0x18   :  { %280 = vmatpush.bf16.msra.mxu2 %v559_v34 }
  0x1a   :  { %179 = vmatpush.bf16.msra.mxu0 %v544_v12 }
  0x1b   :  { %192 = vmatpush.bf16.msra.mxu1 %v552_v13 }
  0x1c   :  { %372 = vmatpush.bf16.msrb.mxu2 %v363_v1 }
  0x1e   :  { %180 = vmatpush.bf16.msra.mxu0 %v543_v17 }
  0x1f   :  { %193 = vmatpush.bf16.msra.mxu1 %v551_v18 }
  0x21   :  { %181 = vmatmul.bf16.vlgmr.msra.gmra.mxu0 %v73_v19 }
  0x22   :  { %194 = vmatmul.bf16.vlgmr.msra.gmra.mxu1 %v74_v20  ;;  %422 = vmatpush.bf16.msrb.mxu0 %v413_v15 }
  0x9e   :  { %v182_v21 = vpop.f32.mrf.mxu0 }
  0x9f   :  { %v195_v22 = vpop.f32.mrf.mxu1 }
  0xa0   :  { %v196_v23 = vadd.f32 %v195_v22, %v182_v21 }
  0xa2   :  { %v200_v24 = vsel %vm199_vm0, %v196_v23, 0.0  ;;  %v203_v25 = vmul.f32 %v196_v23, %v196_v23 }
  0xa3   :  { %201 = vadd.xlane.f32.xlu0 %v200_v24 }
  0xa4   :  { %v204_v28 = vsel %vm199_vm0, %v203_v25, 0.0 }
  0xa6   :  { %v184_v26 = vpop.f32.mrf.mxu0 }
  0xa7   :  { %v197_v27 = vpop.f32.mrf.mxu1 }
  0xab   :  { %205 = vadd.xlane.f32.xlu0 %v204_v28 }
 0x116   :  { %v202_v31 = vpop.xlane.xlu0 %201 }
 0x117   :  { %v207_v33 = vmul.f32 0.015625, %v202_v31 }
 0x119   :  { %v209_v36 = vmul.f32 %v207_v33, %v207_v33  ;;  %v211_v47 = vsub.f32 %v196_v23, %v207_v33 }
 0x11e   :  { %v206_v35 = vpop.xlane.xlu0 %205 }
 0x11f   :  { %v208_v37 = vmul.f32 0.015625, %v206_v35 }
 0x121   :  { %v210_v38 = vsub.f32 %v208_v37, %v209_v36 }
 0x123   :  { %v212_v40 = vadd.f32 1e-05, %v210_v38 }
 0x125   :  { %569 = vrsqrt.f32 %v212_v40  ;;  %vm219_vm2 = vweird.f32 %v212_v40 }
 0x12b   :  { %v570_v41 = vpop.eup %569 }
 0x12c   :  { %v214_v42 = vmul.f32 %v570_v41, %v212_v40  ;;  %vm220_vm1 = vweird.f32 %v570_v41 }
 0x12d   :  { %vm221_vm3 = vmor %vm219_vm2, %vm220_vm1 }
 0x12e   :  { %v215_v43 = vmul.f32 %v570_v41, %v214_v42 }
 0x130   :  { %v216_v44 = vmul.f32 0.5, %v215_v43 }
 0x132   :  { %v217_v45 = vsub.f32 1.5, %v216_v44 }
 0x134   :  { %v218_v46 = vmul.f32 %v570_v41, %v217_v45 }
 0x136   :  { %v222_v49 = vsel %vm221_vm3, %v570_v41, %v218_v46 }
 0x137   :  { %v223_v50 = vmul.f32 %v222_v49, %v211_v47 }
 0x139   :  { %v228_v52 = vmul.f32 %v567_v48, %v223_v50 }
 0x13b   :  { %v233_v53 = vadd.f32 %v568_v51, %v228_v52 }
 0x13d   :  { %vm234_vm4 = vcmp.gt.f32.partialorder %v233_v53, 0.0  ;;  %v235_v54 = vmul.f32 0.01, %v233_v53 }
 0x13f   :  { %v236_v55 = vsel %vm234_vm4, %v233_v53, %v235_v54 }
 0x140   :  { %v237_v56 = vpack.c.bf16 %v236_v55, %v236_v55 }
 0x142   :  { %525 = vmatmul.msk.bf16.vlgmr.msra.gmra.mxu2 %vm199_vm0, %v237_v56 }
 0x1c5   :  { %v282_v59 = vpop.f32.mrf.mxu2 }
 0x1c6   :  { %vm286_vm5 = vcmp.gt.f32.partialorder %v282_v59, 0.0  ;;  %v287_v60 = vmul.f32 0.01, %v282_v59 }
 0x1c8   :  { %v288_v61 = vsel %vm286_vm5, %v282_v59, %v287_v60 }
 0x1c9   :  { %v289_v62 = vpack.c.bf16 %v288_v61, %v288_v61 }
 0x1cb   :  { %534 = vmatmul.msk.bf16.vlgmr.msra.gmra.mxu3 %vm306_vm6, %v289_v62 }
 0x1cc   :  { %398 = vmatpush.bf16.msra.mxu3 %v389_v8 }
 0x1cd   :  { %v284_v63 = vpop.f32.mrf.mxu2 }
 0x24e   :  { %v319_v2 = vpop.f32.mrf.mxu3 }
 0x24f   :  { %vm323_vm8 = vcmp.gt.f32.partialorder %v319_v2, 0.0  ;;  %v324_v3 = vmul.f32 0.01, %v319_v2 }
 0x251   :  { %v325_v4 = vsel %vm323_vm8, %v319_v2, %v324_v3 }
 0x252   :  { %v326_v5 = vpack.c.bf16 %v325_v4, %v325_v4 }
 0x254   :  { %539 = vmatmul.msk.bf16.vlgmr.msrb.gmra.mxu3 %vm335_vm9, %v326_v5 }
 0x256   :  { %v321_v6 = vpop.f32.mrf.mxu3 }
 0x2d7   :  { %v348_v9 = vpop.f32.mrf.mxu3 }
 0x2d8   :  { %vm352_vm11 = vcmp.gt.f32.partialorder %v348_v9, 0.0  ;;  %v353_v10 = vmul.f32 0.01, %v348_v9 }
 0x2da   :  { %v354_v11 = vsel %vm352_vm11, %v348_v9, %v353_v10 }
 0x2db   :  { %v355_v12 = vpack.c.bf16 %v354_v11, %v354_v11 }
 0x2dd   :  { %540 = vmatmul.msk.bf16.vlgmr.msrb.gmra.mxu2 %vm357_vm12, %v355_v12 }
 0x2df   :  { %v350_v13 = vpop.f32.mrf.mxu3 }
 0x360   :  { %v374_v16 = vpop.f32.mrf.mxu2 }
 0x361   :  { %vm378_vm13 = vcmp.gt.f32.partialorder %v374_v16, 0.0  ;;  %v379_v17 = vmul.f32 0.01, %v374_v16 }
 0x363   :  { %v380_v18 = vsel %vm378_vm13, %v374_v16, %v379_v17 }
 0x364   :  { %v381_v19 = vpack.c.bf16 %v380_v18, %v380_v18 }
 0x366   :  { %541 = vmatmul.msk.bf16.vlgmr.msra.gmra.mxu3 %vm383_vm14, %v381_v19 }
 0x368   :  { %v376_v20 = vpop.f32.mrf.mxu2 }
 0x3e9   :  { %v400_v21 = vpop.f32.mrf.mxu3 }
 0x3ea   :  { %vm404_vm15 = vcmp.gt.f32.partialorder %v400_v21, 0.0  ;;  %v405_v22 = vmul.f32 0.01, %v400_v21 }
 0x3ec   :  { %v406_v23 = vsel %vm404_vm15, %v400_v21, %v405_v22 }
 0x3ed   :  { %v407_v24 = vpack.c.bf16 %v406_v23, %v406_v23 }
 0x3ef   :  { %542 = vmatmul.msk.bf16.vlgmr.msrb.gmra.mxu0 %vm383_vm14, %v407_v24 }
 0x3f1   :  { %v402_v25 = vpop.f32.mrf.mxu3 }
 0x46c   :  { %v424_v26 = vpop.f32.mrf.mxu0 }
 0x46d   :  { %428 = vst.msk [vmem:[#allocation2] sm:$0xff] %vm357_vm12, %v424_v26 }
 0x46e   :  { %439 = dma.vmem_to_hbm [thread:$0]  %s435_s23, 128, %s437_s25, [#allocation3]  }
 0x474   :  { %v426_v27 = vpop.f32.mrf.mxu0 }
 0x475   :  { %595 = dma.done.wait [#allocation3], 128  }
 0x476   :  { %596 = vsyncadd [#allocation3], 4294967168 }
 0x477   :  { %444 = vsyncpa [#allocation3], 1 }

</bundles_post_ra>
